<compile_context>
chip_gen: v6e
topology: v6e:2x2x1
jax: 0.10.0
libtpu: 0.0.40
codegen_flags: <defaults>
</compile_context>

<pallas_src>
import functools

import jax
import jax.numpy as jnp
from jax.experimental import pallas as pl
from jax.experimental.pallas import tpu as pltpu


def patch_embed_kernel(x_ref, w_ref, b_ref, o_ref):
    # x_ref: (TILE_M, K_pad)  w_ref: (K_pad, E_pad)  b_ref: (1, E_pad)
    # o_ref: (TILE_M, E_pad)
    acc = jnp.dot(x_ref[...], w_ref[...], preferred_element_type=jnp.float32)
    o_ref[...] = (acc + b_ref[...]).astype(o_ref.dtype)


def _round_up(x, m):
    return (x + m - 1) // m * m


def _vmem_capacity_bytes():
    """Physical VMEM capacity; conservative 64 MiB fallback (v7x per-core)."""
    try:
        cap = getattr(pltpu.get_tpu_info(), "vmem_capacity_bytes", None)
        if cap:
            return int(cap)
    except Exception:
        pass
    return 64 * 1024 * 1024


def _pick_tile_m(M, K_pad, E_pad, in_itemsize, out_itemsize, vmem_budget,
                 target=1024):
    """Largest row tile (multiple of 8, <= target) whose double-buffered working
    set fits the VMEM budget. For small M keep the grid >= 2 steps so both v7x
    TensorCores get work."""
    # VMEM-resident weight + bias (default pipeline keeps 2 buffers each).
    fixed = 2 * (K_pad * E_pad * in_itemsize + E_pad * 4)
    # Streamed per-row cost: input tile (compute dtype) + output tile (out
    # dtype), both double-buffered.
    per_row = 2 * (K_pad * in_itemsize + E_pad * out_itemsize)
    cap = max((vmem_budget - fixed) // max(per_row, 1), 8)
    tile = max(int(min(target, cap)) // 8 * 8, 8)
    if M <= tile:
        tile = max(_round_up(pl.cdiv(M, 2), 8), 8)
    return tile


def patch_embed(x, weight, bias, patch_size,
                compute_dtype=jnp.bfloat16, out_dtype=None):
    """Forward pass of PatchEmbed.

    x:      (B, C, H, W)  NCHW input
    weight: (E, C, p, p)  PyTorch Conv2d weight layout
    bias:   (E,)
    Returns (B, num_patches, E), identical to `proj(x).flatten(2).transpose(1, 2)`.

    compute_dtype: matmul operand dtype (default bf16 -- the op is HBM-bound;
                   accumulation and the bias add are always f32).
    out_dtype:     output dtype (default: x.dtype).
    """
    B, C, H, W = x.shape
    E = weight.shape[0]
    p = patch_size
    assert H % p == 0 and W % p == 0
    nh, nw = H // p, W // p
    num_patches = nh * nw

    out_dtype = x.dtype if out_dtype is None else out_dtype
    x_c = x if compute_dtype is None else x.astype(compute_dtype)

    # ---- patch extraction (layout only; cast first so any materialized
    #      intermediate is already half-size in bf16) ----
    # (B, C, nh, p, nw, p) -> (B, nh, nw, C, p, p) -> (B*num_patches, C*p*p)
    patches = x_c.reshape(B, C, nh, p, nw, p)
    patches = patches.transpose(0, 2, 4, 1, 3, 5)
    patches = patches.reshape(B * num_patches, C * p * p)

    # conv weight (E, C, p, p) -> (C*p*p, E): feature order matches patches.
    w_mat = weight.reshape(E, C * p * p).T.astype(patches.dtype)

    M, K = patches.shape
    in_itemsize = patches.dtype.itemsize
    out_itemsize = jnp.dtype(out_dtype).itemsize

    # Lane-dense contraction and output dims: zero-pad K and E up to 128.
    K_pad = _round_up(K, 128)
    E_pad = _round_up(E, 128)
    if K_pad != K:
        patches = jnp.pad(patches, ((0, 0), (0, K_pad - K)))
        w_mat = jnp.pad(w_mat, ((0, K_pad - K), (0, 0)))
    if E_pad != E:
        w_mat = jnp.pad(w_mat, ((0, 0), (0, E_pad - E)))
    b_mat = jnp.pad(bias.astype(jnp.float32).reshape(1, E),
                    ((0, 0), (0, E_pad - E)))

    # VMEM sizing derived from the actual part (64 MiB on v7x, 128 on v5e/v6e).
    vmem_cap = _vmem_capacity_bytes()
    vmem_budget = int(vmem_cap * 0.60)
    vmem_limit = int(vmem_cap * 0.75)

    tile_m = _pick_tile_m(M, K_pad, E_pad, in_itemsize, out_itemsize, vmem_budget)
    grid_m = pl.cdiv(M, tile_m)   # ragged last block handled by Pallas masking

    cost = pl.CostEstimate(
        flops=2 * M * K_pad * E_pad,
        transcendentals=0,
        bytes_accessed=(M * K_pad + K_pad * E_pad) * in_itemsize
        + M * E_pad * out_itemsize,
    )

    out = pl.pallas_call(
        patch_embed_kernel,
        out_shape=jax.ShapeDtypeStruct((M, E_pad), out_dtype),
        grid_spec=pltpu.PrefetchScalarGridSpec(
            num_scalar_prefetch=0,
            grid=(grid_m,),
            in_specs=[
                pl.BlockSpec((tile_m, K_pad), lambda i: (i, 0)),  # streamed rows
                pl.BlockSpec((K_pad, E_pad), lambda i: (0, 0)),   # resident weight
                pl.BlockSpec((1, E_pad), lambda i: (0, 0)),       # resident bias
            ],
            out_specs=pl.BlockSpec((tile_m, E_pad), lambda i: (i, 0)),
        ),
        compiler_params=pltpu.CompilerParams(
            dimension_semantics=("parallel",),       # row tiles independent
            vmem_limit_bytes=vmem_limit,
            allow_input_fusion=[True, False, False],  # fuse patchify into DMA
        ),
        cost_estimate=cost,
    )(patches, w_mat, b_mat)

    if E_pad != E:
        out = out[:, :E]
    return out.reshape(B, num_patches, E)


if __name__ == "__main__":
    # Small-shape instantiation of PatchEmbed(img_size=16, patch_size=4,
    # in_chans=4, embed_dim=32)
    B, C, H, W = 2, 4, 16, 16
    patch_size = 4
    embed_dim = 32

    key = jax.random.PRNGKey(0)
    kx, kw, kb = jax.random.split(key, 3)
    x = jax.random.normal(kx, (B, C, H, W), dtype=jnp.float32)
    fan_in = C * patch_size * patch_size
    weight = jax.random.normal(
        kw, (embed_dim, C, patch_size, patch_size), dtype=jnp.float32
    ) * (1.0 / fan_in) ** 0.5
    bias = jax.random.normal(kb, (embed_dim,), dtype=jnp.float32) * 0.02

    # Reference: XLA conv at highest precision (same semantics as nn.Conv2d
    # with stride == kernel == patch_size).
    ref = jax.lax.conv_general_dilated(
        x, weight, window_strides=(patch_size, patch_size), padding="VALID",
        dimension_numbers=("NCHW", "OIHW", "NCHW"),
        precision=jax.lax.Precision.HIGHEST)
    ref = ref + bias.reshape(1, embed_dim, 1, 1)
    ref = ref.reshape(B, embed_dim, -1).transpose(0, 2, 1)
    num_patches = (H // patch_size) * (W // patch_size)

    # Default path: bf16 operands, f32 accumulation (bf16-level tolerance).
    fwd_bf16 = jax.jit(functools.partial(patch_embed, patch_size=patch_size))
    out = jax.block_until_ready(fwd_bf16(x, weight, bias))
    assert out.shape == (B, num_patches, embed_dim)
    assert out.dtype == x.dtype
    assert jnp.allclose(out, ref, atol=5e-2, rtol=5e-2)

    # Full-precision path.
    fwd_f32 = jax.jit(functools.partial(patch_embed, patch_size=patch_size,
                                        compute_dtype=None))
    out_f32 = jax.block_until_ready(fwd_f32(x, weight, bias))
    assert jnp.allclose(out_f32, ref, atol=1e-2, rtol=1e-2)

    print("KERNEL_OK")
</pallas_src>

<mosaic_0001>
module attributes {stable_mosaic.version = 11 : i64} {
  func.func @patch_embed_kernel(%arg0: i32, %arg1: memref<16x128xbf16, #tpu.memory_space<vmem>>, %arg2: memref<128x128xbf16, #tpu.memory_space<vmem>>, %arg3: memref<1x128xf32, #tpu.memory_space<vmem>>, %arg4: memref<16x128xf32, #tpu.memory_space<vmem>>) attributes {dimension_semantics = [#tpu.dimension_semantics<parallel>], iteration_bounds = array<i64: 2>, scalar_prefetch = 0 : i64, scratch_operands = 0 : i64, tpu.core_type = #tpu.core_type<tc>, window_params = [{transform_indices = @transform_0, window_bounds = array<i64: 16, 128>}, {pipeline_mode = #tpu.pipeline_mode<synchronous>, transform_indices = @transform_1, window_bounds = array<i64: 128, 128>}, {pipeline_mode = #tpu.pipeline_mode<synchronous>, transform_indices = @transform_2, window_bounds = array<i64: 1, 128>}, {transform_indices = @transform_3, window_bounds = array<i64: 16, 128>}]} {
    %c0 = arith.constant 0 : index
    %c0_0 = arith.constant 0 : index
    %0 = vector.load %arg1[%c0, %c0_0] : memref<16x128xbf16, #tpu.memory_space<vmem>>, vector<16x128xbf16>
    %c0_1 = arith.constant 0 : index
    %c0_2 = arith.constant 0 : index
    %1 = vector.load %arg2[%c0_1, %c0_2] : memref<128x128xbf16, #tpu.memory_space<vmem>>, vector<128x128xbf16>
    %cst = arith.constant dense<0.000000e+00> : vector<16x128xf32>
    %2 = tpu.matmul %0, %1, %cst {dimension_numbers = #tpu.dot_dimension_numbers<[1], [0], [0], [1], [0, 0, 1, 1], [], []>} : vector<16x128xbf16>, vector<128x128xbf16>, vector<16x128xf32> -> vector<16x128xf32>
    %c0_3 = arith.constant 0 : index
    %c0_4 = arith.constant 0 : index
    %3 = vector.load %arg3[%c0_3, %c0_4] : memref<1x128xf32, #tpu.memory_space<vmem>>, vector<1x128xf32>
    %4 = vector.broadcast %3 : vector<1x128xf32> to vector<16x128xf32>
    %5 = arith.addf %2, %4 : vector<16x128xf32>
    %c0_5 = arith.constant 0 : index
    %c0_6 = arith.constant 0 : index
    %6 = vector.load %arg4[%c0_5, %c0_6] : memref<16x128xf32, #tpu.memory_space<vmem>>, vector<16x128xf32>
    tpu.vector_store %arg4[%c0_5, %c0_6], %5 {strides = array<i32>} : memref<16x128xf32, #tpu.memory_space<vmem>>, vector<16x128xf32>,
    return
  }
  func.func @transform_0(%arg0: i32) -> (i32, i32) {
    %c0_i32 = arith.constant 0 : i32
    %c0_i32_0 = arith.constant 0 : i32
    return %arg0, %c0_i32 : i32, i32
  }
  func.func @transform_1(%arg0: i32) -> (i32, i32) {
    %c0_i32 = arith.constant 0 : i32
    %c0_i32_0 = arith.constant 0 : i32
    %c0_i32_1 = arith.constant 0 : i32
    return %c0_i32, %c0_i32_0 : i32, i32
  }
  func.func @transform_2(%arg0: i32) -> (i32, i32) {
    %c0_i32 = arith.constant 0 : i32
    %c0_i32_0 = arith.constant 0 : i32
    %c0_i32_1 = arith.constant 0 : i32
    return %c0_i32, %c0_i32_0 : i32, i32
  }
  func.func @transform_3(%arg0: i32) -> (i32, i32) {
    %c0_i32 = arith.constant 0 : i32
    %c0_i32_0 = arith.constant 0 : i32
    return %arg0, %c0_i32 : i32, i32
  }
}

</mosaic_0001>

<bundles_post_ra>
// kernel: patch_embed.2
= control target key start
LH: loop header
LB: loop body
LE: loop exit
PB: predicated region body
PF: predicated region fallthrough
CT: control target
= control target key end

     0   :  { %s753_s0 = inlined_call_operand.vmem [shape: bf16[128,128], index: 0, kind: input, shape index: {}]   ;;  %s754_s1 = inlined_call_operand.vmem [shape: f32[1,128], index: 1, kind: input, shape index: {}]   ;;  %s755_s2 = inlined_call_operand.vmem [shape: bf16[32,64], index: 2, kind: input, shape index: {}]   ;;  %s756_s3 = inlined_call_operand.<no memory space> [shape: bf16[], index: 3, kind: input, shape index: {}]   ;;  %s757_s4 = inlined_call_operand.hbm [shape: f32[32,128], index: 4, kind: output, shape index: {}]  }
   0x1   :  { %v9_v0 = vstv %s756_s3 }
   0x2   :  { %v621_v1 = vunpack.i.l.bf16 %v9_v0 }
   0x3   :  { %14 = vsyncpa [#allocation8], 0 }
   0x4   :  { %16 = vsyncpa [#allocation8 + $0x1], 0  ;;  %s623_s17 = smov 0   ;;  %s625_s18 = smov 0  }
   0x5   :  { %s627_s19 = smov 0   ;;  %s629_s20 = smov 0  }
   0x6 LB: > { %s644_s3 = sadd.s32 4294967295, %s586_s20   ;;  %s421_s21 = sadd.s32 4294967294, %s586_s20   ;;  %s586_s20 = sphi %s629_s20, %s763_s20   ;;  %s582_s19 = sphi %s627_s19, %s762_s19   ;;  %s578_s18 = sphi %s625_s18, %s761_s18   ;;  %s574_s17 = sphi %s623_s17, %s760_s17  }
   0x7   : > { %s648_s22 = sadd.s32 1, %s586_s20   ;;  %s97_s23 = sadd.s32 1, %s582_s19 }
   0x8   : > { %s94_s24 = ssub.s32 %s586_s20, %s648_s22  ;;  %p107_p0 = scmp.ne.s32.totalorder %s582_s19, %s578_s18 }
   0x9   : > { %p95_p1 = scmp.eq.s32.totalorder %s94_s24, 0  ;;  %p108_p2 = scmp.eq.s32.totalorder %s644_s3, 1 }
   0xa   : > { %p113_p3 = scmp.ne.s32.totalorder %s578_s18, %s574_s17  ;;  %p114_p4 = scmp.eq.s32.totalorder %s421_s21, 1 }
   0xb   : > { %s659_s25 = scalar_select %p95_p1, %s582_s19, %s97_s23  }
   0xc   : > { %p661_p5 = por %p108_p2, %p107_p0  ;;  %p665_p6 = por %p114_p4, %p113_p3 }
   0xd   : > { %p424_p7 = scmp.ge.s32.totalorder %s586_s20, 1  ;;  %p147_p8 = scmp.lt.s32.totalorder %s586_s20, 3 }
   0xf   : > { %p148_p9 = pnand %p424_p7, %p147_p8 }
  0x11   : > { %151 = sbr.rel (%p148_p9) target bundleno = 268 (0x10c), region = 32 }
  0x16   : > { %v517_v2 = vld [vmem:[%s753_s0 + $0x38] sm:$0xff]   ;;  %v588_v3 = vmov 0.0   ;;  %v190_v4 = vlaneseq  ;;  %v518_v5 = vld [vmem:[%s753_s0 + $0x30] sm:$0xff]   ;;  %vm589_vm0 = vmmov 0   ;;  %s426_s6 = sshll.u32 %s644_s3, 1  ;;  %v519_v7 = vld [vmem:[%s753_s0 + $0x28] sm:$0xff]  }
  0x17   : > { %454 = vmatprep.subr.bf16.mxu0 %v588_v3  ;;  %470 = vmatprep.mubr.msk.bf16.mxu0 %vm589_vm0, %v588_v3  ;;  %p172_p10 = scmp.lt.s32.totalorder %s426_s6, 3  ;;  %v520_v9 = vld [vmem:[%s753_s0 + $0x20] sm:$0xff]   ;;  %v521_v16 = vld [vmem:[%s753_s0 + $0x18] sm:$0xff]   ;;  %v522_v17 = vld [vmem:[%s753_s0 + $0x10] sm:$0xff]   ;;  %s168_s5 = sand.u32 1, %s578_s18  }
  0x18   : > { %455 = vmatpush3.bf16.msra.mxu0 %v517_v2  ;;  %v191_v6 = vand.u32 127, %v190_v4  ;;  %v523_v18 = vld [vmem:[%s753_s0 + $0x8] sm:$0xff]   ;;  %v524_v19 = vld [vmem:[%s753_s0] sm:$0xff]   ;;  %s444_s11 = sshll.u32 %s644_s3, 8  ;;  %s713_s15 = scalar_lea.sflag [#allocation8], %s168_s5 }
  0x19   : > { %456 = vmatprep.subr.bf16.mxu0 %v588_v3  ;;  %s765_s6 = smov (!%p172_p10, %s426_s6), 3  ;;  %v429_v21 = vld [vmem:[%s754_s1] ss:$0 sm:$0xff]  ;;  %s711_s14 = scalar_lea.hbm %s757_s4, %s444_s11 }
  0x1a   : > { %s427_s9 = sshll.u32 %s765_s6, 2  ;;  %vm193_vm1 = vcmp.lt.s32.totalorder %v191_v6, 64  ;;  %s425_s6 = sshll.u32 %s168_s5, 4 }
  0x1b   : > { %s175_s12 = scalar_lea.vmem %s755_s2, %s427_s9  ;;  %s170_s9 = scalar_lea.vmem [#allocation7], %s425_s6 }
  0x1c   : > { %457 = vmatpush3.bf16.msra.mxu0 %v518_v5  ;;  %v187_v8 = vld [vmem:[%s175_s12] sm:$0xff]   ;;  %s359_s10 = sshll.u32 %s170_s9, 4  ;;  %s590_s3 = smov [#allocation7]   ;;  %s706_s10 = int_to_ptr.vmem [resolvable:$true] %s359_s10 }
  0x1d   : > { %458 = vmatprep.subr.bf16.mxu0 %v588_v3  ;;  %v188_v10 = vunpack.c.l.bf16 %v187_v8  ;;  %v210_v11 = vunpack.c.h.bf16 %v187_v8  ;;  %s526_s16 = scalar_lea.vmem %s706_s10, 256  ;;  %s530_s21 = sshll.u32 %s590_s3, 4  ;;  %s531_s21 = int_to_ptr.vmem [resolvable:$false] %s530_s21 }
  0x1e   : > { %p527_p11 = scmp.ne.s32.totalorder %s706_s10, %s526_s16  ;;  %s532_s23 = scalar_lea.vmem %s531_s21, 512 }
  0x1f   : > { %v194_v12 = vsel %vm193_vm1, %v188_v10, %v621_v1  ;;  %v216_v13 = vsel %vm193_vm1, %v210_v11, %v621_v1  ;;  %p533_p0 = scmp.lt.s32.totalorder %s706_s10, %s531_s21  ;;  %p534_p1 = scmp.lt.s32.totalorder %s532_s23, %s526_s16 }
  0x20   : > { %459 = vmatpush3.bf16.msra.mxu0 %v519_v7  ;;  %v195_v14 = vpack.c.bf16 %v588_v3, %v194_v12  ;;  %v218_v15 = vpack.c.bf16 %v588_v3, %v216_v13  ;;  %p528_p12 = pnand %p527_p11, %p661_p5 }
  0x21   : > { %460 = vmatprep.subr.bf16.mxu0 %v588_v3  ;;  %p535_p2 = por %p534_p1, %p533_p0 }
  0x22   : > { %198 = vst [vmem:[#allocation9] sm:$0xf] %v195_v14  ;;  %221 = vst [vmem:[#allocation9 + $0x4] sm:$0xf] %v218_v15  ;;  %p529_p13 = pneg %p528_p12 }
  0x24   : > { %461 = vmatpush3.bf16.msra.mxu0 %v520_v9  ;;  %p536_p3 = pnand %p535_p2, %p529_p13 }
  0x25   : > { %462 = vmatprep.subr.bf16.mxu0 %v588_v3 }
  0x28   : > { %463 = vmatpush3.bf16.msra.mxu0 %v521_v16 }
  0x29   : > { %464 = vmatprep.subr.bf16.mxu0 %v588_v3  ;;  %v525_v20 = vld [vmem:[#allocation9] sm:$0xff]  }
  0x2c   : > { %465 = vmatpush3.bf16.msra.mxu0 %v522_v17 }
  0x2d   : > { %466 = vmatprep.subr.bf16.mxu0 %v588_v3 }
  0x30   : > { %467 = vmatpush3.bf16.msra.mxu0 %v523_v18 }
  0x31   : > { %468 = vmatprep.subr.bf16.mxu0 %v588_v3 }
  0x34   : > { %469 = vmatpush3.bf16.msra.mxu0 %v524_v19 }
  0x37   : > { %471 = vmatmul.mubr.bf16.vlgmr.msra.gmra.mxu0 %v525_v20 }
  0xf7   : > { %v336_v22 = vpop.f32.mrf.mxu0 }
  0xf8   : > { %v337_v23 = vadd.f32 %v429_v21, %v336_v22 }
  0xf9   : > { %v472_v24 = vpop.f32.mrf.mxu0 }
  0xfa   : > { %343 = vst [vmem:[%s170_s9] sm:$0xff] %v337_v23 }
  0xfb   : > { %v339_v25 = vpop.f32.mrf.mxu0 }
  0xfc   : > { %v340_v26 = vadd.f32 %v429_v21, %v339_v25 }
  0xfd   : > { %v473_v27 = vpop.f32.mrf.mxu0 }
  0xfe   : > { %344 = vst [vmem:[%s170_s9 + $0x8] sm:$0xff] %v340_v26 }
  0xff   : > { %539 = shalt.err (!%p536_p3)
}
 0x100   : > { %s540_s24 = scalar_lea.hbm %s711_s14, 256  ;;  %s544_s30 = scalar_lea.hbm %s757_s4, 512 }
 0x101   : > { %p541_p4 = scmp.ne.s32.totalorder %s711_s14, %s540_s24  ;;  %p545_p9 = scmp.lt.s32.totalorder %s711_s14, %s757_s4 }
 0x102   : > { %p546_p10 = scmp.lt.s32.totalorder %s544_s30, %s540_s24 }
 0x103   : > { %p542_p7 = pnand %p541_p4, %p661_p5 }
 0x104   : > { %p547_p11 = por %p546_p10, %p545_p9 }
 0x105   : > { %p543_p8 = pneg %p542_p7 }
 0x107   : > { %p548_p12 = pnand %p547_p11, %p543_p8 }
 0x109   : > { %551 = shalt.err (!%p548_p12)
}
 0x10a   : > { %s591_s7 = smov 128   ;;  %s592_s8 = smov 8  }
 0x10b   : > { %474 = dma.vmem_to_hbm [thread:$0]  (%p661_p5), %s706_s10, 256, %s711_s14, %s713_s15, %s591_s7, %s591_s7, %s592_s8  }
 0x10c PF: > { %p480_p13 = scmp.ge.s32.totalorder %s586_s20, 2  ;;  %s374_s9 = sand.u32 1, %s574_s17  }
 0x10d   : > { %s375_s11 = scalar_lea.sflag [#allocation8], %s374_s9 }
 0x10e   : > { %p477_p0 = pnand %p480_p13, %p665_p6 }
 0x110   : > { %p478_p1 = pneg %p477_p0 }
 0x112   : > { %569 = dma.done.wait (%p478_p1), %s375_s11, 256  }
 0x113   : > { %571 = vsyncadd (%p478_p1), %s375_s11, 4294967040  ;;  %p19_p2 = scmp.ge.s32.totalorder %s648_s22, 4   ;;  %s760_s17 = smov %s578_s18 }
 0x114   : > { %s761_s18 = smov %s582_s19  ;;  %s762_s19 = smov %s659_s25 }
 0x115   : > { %s763_s20 = smov %s648_s22  ;;  %21 = sbr.rel (!%p19_p2) target bundleno = 6 (0x6), region = 69 }
 0x11a   :  { %380 = vsyncpa [#allocation8], 1 }
 0x11b   :  { %382 = vsyncpa [#allocation8 + $0x1], 1 }

</bundles_post_ra>
